<compile_context>
chip_gen: v5e
topology: v5e:2x2
jax: 0.10.0
libtpu: 0.0.40
codegen_flags: <defaults>
</compile_context>

<pallas_src>
import jax
import jax.numpy as jnp
from jax import lax
from jax.experimental import pallas as pl
from jax.experimental.pallas import tpu as pltpu

_LANE = 128
_TILE_CAP = 4096                  # rows per grid step (step-overhead bound workload)
_VMEM_TARGET = 28 * 1024 * 1024   # working-set budget safe on v5e/v6e/v7x


def _round_up(x, m):
    return ((x + m - 1) // m) * m


def _cdiv(a, b):
    return -(-a // b)


def _vmem_need(tile_b, row_bytes, weight_bytes, hidden, latent):
    io_in = 2 * tile_b * row_bytes            # double-buffered input tiles
    io_out = 2 * tile_b * 4                   # double-buffered (1, tile_b) f32 output
    act = tile_b * (hidden + latent) * 4      # f32 activation temporaries
    return io_in + io_out + act + weight_bytes


def _plan_tiles(B, row_bytes, weight_bytes, hidden, latent):
    """Pick (tile_b, num_tiles, b_pad): large lane-aligned tiles, VMEM-aware,
    >= 2 grid steps once there are >= 2 lane-tiles of rows (v7x megacore),
    padding only as much as the chosen tiling actually needs."""
    b128 = _round_up(max(B, 1), _LANE)
    min_tiles = 2 if b128 >= 2 * _LANE else 1
    num_tiles = max(min_tiles, _cdiv(b128, _TILE_CAP))
    tile_b = _round_up(_cdiv(b128, num_tiles), _LANE)
    while tile_b > _LANE and _vmem_need(tile_b, row_bytes, weight_bytes,
                                        hidden, latent) > _VMEM_TARGET:
        tile_b -= _LANE
    num_tiles = _cdiv(b128, tile_b)
    return tile_b, num_tiles, num_tiles * tile_b


def _critic_kernel_qsa(obs_ref, act_ref, w1o_ref, w1a_ref, b1_ref,
                       w2_ref, b2_ref, wl_ref, bl_ref, out_ref):
    # Layer 1: the obs/action concat is folded into two dots.
    obs = obs_ref[...].astype(w1o_ref.dtype)
    act = act_ref[...].astype(w1a_ref.dtype)
    h1 = jnp.dot(obs, w1o_ref[...], preferred_element_type=jnp.float32)
    h1 = h1 + jnp.dot(act, w1a_ref[...], preferred_element_type=jnp.float32)
    h1 = jnp.maximum(h1 + b1_ref[...], 0.0)                    # f32 epilogue

    # Layer 2.
    h2 = jnp.dot(h1.astype(w2_ref.dtype), w2_ref[...],
                 preferred_element_type=jnp.float32)
    h2 = jnp.maximum(h2 + b2_ref[...], 0.0)                    # (tile_b, latent)

    # Value head: M=1 MXU contraction emits the lane-dense (1, tile_b) row
    # directly (no XLU reduce + sublane->lane relayout).
    v = lax.dot_general(wl_ref[...], h2, (((1,), (1,)), ((), ())),
                        preferred_element_type=jnp.float32)    # (1, tile_b)
    out_ref[...] = v + bl_ref[...]


def _critic_kernel_vs(obs_ref, w1o_ref, b1_ref, w2_ref, b2_ref,
                      wl_ref, bl_ref, out_ref):
    # obs-only variant: no dummy action stream, no zero-weight matmul.
    obs = obs_ref[...].astype(w1o_ref.dtype)
    h1 = jnp.maximum(
        jnp.dot(obs, w1o_ref[...], preferred_element_type=jnp.float32)
        + b1_ref[...], 0.0)
    h2 = jnp.maximum(
        jnp.dot(h1.astype(w2_ref.dtype), w2_ref[...],
                preferred_element_type=jnp.float32) + b2_ref[...], 0.0)
    v = lax.dot_general(wl_ref[...], h2, (((1,), (1,)), ((), ())),
                        preferred_element_type=jnp.float32)
    out_ref[...] = v + bl_ref[...]


def critic_forward(obs, actions, params):
    """obs: (B, obs_dim); actions: optional (B, ...) flattened along dim 1.

    bf16 inputs are streamed as-is (half the input DMA bytes); any other dtype
    is treated as f32 like the PyTorch module.
    """
    w1o, w1a, b1, w2, b2, wl, bl = params
    obs = jnp.asarray(obs)
    if obs.dtype != jnp.bfloat16:
        obs = obs.astype(jnp.float32)
    B, obs_dim = obs.shape
    hidden = w1o.shape[1]
    latent = w2.shape[1]
    has_act = actions is not None

    if has_act:
        act = jnp.asarray(actions)
        if act.dtype != jnp.bfloat16:
            act = act.astype(jnp.float32)
        act = act.reshape(B, -1)
        act_dim = act.shape[1]
    else:
        act = None
        act_dim = 0

    row_bytes = obs_dim * obs.dtype.itemsize
    if has_act:
        row_bytes += act_dim * act.dtype.itemsize
    weight_bytes = sum(int(p.size) * p.dtype.itemsize for p in params)
    tile_b, num_tiles, b_pad = _plan_tiles(B, row_bytes, weight_bytes,
                                           hidden, latent)

    if b_pad != B:
        obs = jnp.pad(obs, ((0, b_pad - B), (0, 0)))
        if has_act:
            act = jnp.pad(act, ((0, b_pad - B), (0, 0)))

    # Extra input buffering only in the small-tile / many-step regime.
    if tile_b <= 256 and num_tiles >= 4:
        in_kw = dict(pipeline_mode=pl.Buffered(3))
    else:
        in_kw = {}

    def tiled(cols):
        return pl.BlockSpec((tile_b, cols), lambda i: (i, 0), **in_kw)

    def resident(rows, cols):
        # Same block every grid step -> weights/biases stay VMEM-resident.
        return pl.BlockSpec((rows, cols), lambda i: (0, 0))

    if has_act:
        kernel = _critic_kernel_qsa
        inputs = (obs, act, w1o, w1a, b1, w2, b2, wl, bl)
        in_specs = [
            tiled(obs_dim), tiled(act_dim),
            resident(obs_dim, hidden), resident(w1a.shape[0], hidden),
            resident(1, hidden), resident(hidden, latent), resident(1, latent),
            resident(1, latent), resident(1, 1),
        ]
    else:
        kernel = _critic_kernel_vs
        inputs = (obs, w1o, b1, w2, b2, wl, bl)
        in_specs = [
            tiled(obs_dim),
            resident(obs_dim, hidden), resident(1, hidden),
            resident(hidden, latent), resident(1, latent),
            resident(1, latent), resident(1, 1),
        ]

    flops = 2 * b_pad * (obs_dim * hidden + act_dim * hidden
                         + hidden * latent + latent)
    bytes_accessed = int(
        obs.size * obs.dtype.itemsize
        + (act.size * act.dtype.itemsize if has_act else 0)
        + weight_bytes + b_pad * 4)
    need = _vmem_need(tile_b, row_bytes, weight_bytes, hidden, latent)
    vmem_limit = int(min(48 * 1024 * 1024, max(16 * 1024 * 1024, 2 * need)))

    out = pl.pallas_call(
        kernel,
        out_shape=jax.ShapeDtypeStruct((1, b_pad), jnp.float32),
        grid=(num_tiles,),
        in_specs=in_specs,
        out_specs=pl.BlockSpec((1, tile_b), lambda i: (0, i)),
        compiler_params=pltpu.CompilerParams(
            dimension_semantics=("parallel",),
            vmem_limit_bytes=vmem_limit),
        cost_estimate=pl.CostEstimate(
            flops=int(flops), transcendentals=0,
            bytes_accessed=bytes_accessed),
    )(*inputs)

    return out.reshape(-1)[:B, None]                    # back to (B, 1)


def critic_reference(obs, actions, params):
    """Pure-JAX reference with identical dtype handling."""
    w1o, w1a, b1, w2, b2, wl, bl = params
    obs = jnp.asarray(obs, jnp.float32)
    h1 = jnp.dot(obs.astype(w1o.dtype), w1o, preferred_element_type=jnp.float32)
    if actions is not None:
        act = jnp.asarray(actions, jnp.float32).reshape(obs.shape[0], -1)
        h1 = h1 + jnp.dot(act.astype(w1a.dtype), w1a,
                          preferred_element_type=jnp.float32)
    h1 = jnp.maximum(h1 + b1, 0.0)
    h2 = jnp.dot(h1.astype(w2.dtype), w2, preferred_element_type=jnp.float32)
    h2 = jnp.maximum(h2 + b2, 0.0)
    return jnp.sum(h2 * wl, axis=-1, keepdims=True) + bl


def init_params(key, obs_dim, act_dim, hidden, latent,
                weight_dtype=jnp.bfloat16):
    """PyTorch-Linear-style init. Matmul weights stored in `weight_dtype`
    (bf16 by default; pass jnp.float32 for an f32-exact evaluation path);
    biases and the value-head row stay f32."""
    in_dim = obs_dim + act_dim
    ks = jax.random.split(key, 6)

    def lin(kw, kb, fan_in, fan_out):
        bound = fan_in ** -0.5
        w = jax.random.uniform(kw, (fan_in, fan_out), jnp.float32, -bound, bound)
        b = jax.random.uniform(kb, (1, fan_out), jnp.float32, -bound, bound)
        return w, b

    w1, b1 = lin(ks[0], ks[1], in_dim, hidden)
    w2, b2 = lin(ks[2], ks[3], hidden, latent)
    wl_col, bl = lin(ks[4], ks[5], latent, 1)              # value head
    w1o, w1a = w1[:obs_dim], w1[obs_dim:]
    wl = wl_col.reshape(1, latent)                         # row vector (M=1 head)
    return (w1o.astype(weight_dtype), w1a.astype(weight_dtype), b1,
            w2.astype(weight_dtype), b2, wl, bl)


if __name__ == "__main__":
    key = jax.random.PRNGKey(0)
    k_obs, k_act, k_par, k_obs2, k_act2 = jax.random.split(key, 5)

    B, obs_dim, act_dim = 8, 24, 8
    hidden = 32
    latent = 32                                            # backbone.output_dim

    obs = jax.random.normal(k_obs, (B, obs_dim), jnp.float32)
    actions = jax.random.normal(k_act, (B, act_dim), jnp.float32)
    params = init_params(k_par, obs_dim, act_dim, hidden, latent)

    # Q(s, a) path.
    values = jax.block_until_ready(critic_forward(obs, actions, params))
    ref = critic_reference(obs, actions, params)
    assert values.shape == (B, 1)
    assert jnp.allclose(values, ref, atol=1e-4, rtol=1e-4), \
        float(jnp.max(jnp.abs(values - ref)))

    # V(s) path (actions=None) -> dedicated obs-only kernel.
    values_v = jax.block_until_ready(critic_forward(obs, None, params))
    ref_v = critic_reference(obs, None, params)
    assert values_v.shape == (B, 1)
    assert jnp.allclose(values_v, ref_v, atol=1e-4, rtol=1e-4), \
        float(jnp.max(jnp.abs(values_v - ref_v)))

    # Ragged, multi-tile batch: exercises >= 2 grid steps (v7x megacore path)
    # and minimal padding + slice-off of the padded rows.
    B2 = 300
    obs2 = jax.random.normal(k_obs2, (B2, obs_dim), jnp.float32)
    act2 = jax.random.normal(k_act2, (B2, act_dim), jnp.float32)
    values2 = jax.block_until_ready(critic_forward(obs2, act2, params))
    ref2 = critic_reference(obs2, act2, params)
    assert values2.shape == (B2, 1)
    assert jnp.allclose(values2, ref2, atol=1e-4, rtol=1e-4), \
        float(jnp.max(jnp.abs(values2 - ref2)))

    print("KERNEL_OK")
</pallas_src>

<mosaic_0001>
module attributes {stable_mosaic.version = 11 : i64} {
  func.func @_critic_kernel_qsa(%arg0: i32, %arg1: memref<128x24xf32, #tpu.memory_space<vmem>>, %arg2: memref<128x8xf32, #tpu.memory_space<vmem>>, %arg3: memref<24x32xbf16, #tpu.memory_space<vmem>>, %arg4: memref<8x32xbf16, #tpu.memory_space<vmem>>, %arg5: memref<1x32xf32, #tpu.memory_space<vmem>>, %arg6: memref<32x32xbf16, #tpu.memory_space<vmem>>, %arg7: memref<1x32xf32, #tpu.memory_space<vmem>>, %arg8: memref<1x32xf32, #tpu.memory_space<vmem>>, %arg9: memref<1x1xf32, #tpu.memory_space<vmem>>, %arg10: memref<1x128xf32, #tpu.memory_space<vmem>>) attributes {dimension_semantics = [#tpu.dimension_semantics<parallel>], iteration_bounds = array<i64: 1>, scalar_prefetch = 0 : i64, scratch_operands = 0 : i64, tpu.core_type = #tpu.core_type<tc>, window_params = [{transform_indices = @transform_0, window_bounds = array<i64: 128, 24>}, {transform_indices = @transform_1, window_bounds = array<i64: 128, 8>}, {pipeline_mode = #tpu.pipeline_mode<synchronous>, transform_indices = @transform_2, window_bounds = array<i64: 24, 32>}, {pipeline_mode = #tpu.pipeline_mode<synchronous>, transform_indices = @transform_3, window_bounds = array<i64: 8, 32>}, {pipeline_mode = #tpu.pipeline_mode<synchronous>, transform_indices = @transform_4, window_bounds = array<i64: 1, 32>}, {pipeline_mode = #tpu.pipeline_mode<synchronous>, transform_indices = @transform_5, window_bounds = array<i64: 32, 32>}, {pipeline_mode = #tpu.pipeline_mode<synchronous>, transform_indices = @transform_6, window_bounds = array<i64: 1, 32>}, {pipeline_mode = #tpu.pipeline_mode<synchronous>, transform_indices = @transform_7, window_bounds = array<i64: 1, 32>}, {pipeline_mode = #tpu.pipeline_mode<synchronous>, transform_indices = @transform_8, window_bounds = array<i64: 1, 1>}, {transform_indices = @transform_9, window_bounds = array<i64: 1, 128>}]} {
    %c0 = arith.constant 0 : index
    %c0_0 = arith.constant 0 : index
    %0 = vector.load %arg1[%c0, %c0_0] : memref<128x24xf32, #tpu.memory_space<vmem>>, vector<128x24xf32>
    %1 = arith.truncf %0 : vector<128x24xf32> to vector<128x24xbf16>
    %c0_1 = arith.constant 0 : index
    %c0_2 = arith.constant 0 : index
    %2 = vector.load %arg2[%c0_1, %c0_2] : memref<128x8xf32, #tpu.memory_space<vmem>>, vector<128x8xf32>
    %3 = arith.truncf %2 : vector<128x8xf32> to vector<128x8xbf16>
    %c0_3 = arith.constant 0 : index
    %c0_4 = arith.constant 0 : index
    %4 = vector.load %arg3[%c0_3, %c0_4] : memref<24x32xbf16, #tpu.memory_space<vmem>>, vector<24x32xbf16>
    %cst = arith.constant dense<0.000000e+00> : vector<128x32xf32>
    %5 = tpu.matmul %1, %4, %cst {dimension_numbers = #tpu.dot_dimension_numbers<[1], [0], [0], [1], [0, 0, 1, 1], [], []>} : vector<128x24xbf16>, vector<24x32xbf16>, vector<128x32xf32> -> vector<128x32xf32>
    %c0_5 = arith.constant 0 : index
    %c0_6 = arith.constant 0 : index
    %6 = vector.load %arg4[%c0_5, %c0_6] : memref<8x32xbf16, #tpu.memory_space<vmem>>, vector<8x32xbf16>
    %cst_7 = arith.constant dense<0.000000e+00> : vector<128x32xf32>
    %7 = tpu.matmul %3, %6, %cst_7 {dimension_numbers = #tpu.dot_dimension_numbers<[1], [0], [0], [1], [0, 0, 1, 1], [], []>} : vector<128x8xbf16>, vector<8x32xbf16>, vector<128x32xf32> -> vector<128x32xf32>
    %8 = arith.addf %5, %7 : vector<128x32xf32>
    %c0_8 = arith.constant 0 : index
    %c0_9 = arith.constant 0 : index
    %9 = vector.load %arg5[%c0_8, %c0_9] : memref<1x32xf32, #tpu.memory_space<vmem>>, vector<1x32xf32>
    %10 = vector.broadcast %9 : vector<1x32xf32> to vector<128x32xf32>
    %11 = arith.addf %8, %10 : vector<128x32xf32>
    %cst_10 = arith.constant 0.000000e+00 : f32
    %12 = vector.broadcast %cst_10 : f32 to vector<128x32xf32>
    %13 = arith.maximumf %11, %12 : vector<128x32xf32>
    %14 = arith.truncf %13 : vector<128x32xf32> to vector<128x32xbf16>
    %c0_11 = arith.constant 0 : index
    %c0_12 = arith.constant 0 : index
    %15 = vector.load %arg6[%c0_11, %c0_12] : memref<32x32xbf16, #tpu.memory_space<vmem>>, vector<32x32xbf16>
    %cst_13 = arith.constant dense<0.000000e+00> : vector<128x32xf32>
    %16 = tpu.matmul %14, %15, %cst_13 {dimension_numbers = #tpu.dot_dimension_numbers<[1], [0], [0], [1], [0, 0, 1, 1], [], []>} : vector<128x32xbf16>, vector<32x32xbf16>, vector<128x32xf32> -> vector<128x32xf32>
    %c0_14 = arith.constant 0 : index
    %c0_15 = arith.constant 0 : index
    %17 = vector.load %arg7[%c0_14, %c0_15] : memref<1x32xf32, #tpu.memory_space<vmem>>, vector<1x32xf32>
    %18 = vector.broadcast %17 : vector<1x32xf32> to vector<128x32xf32>
    %19 = arith.addf %16, %18 : vector<128x32xf32>
    %cst_16 = arith.constant 0.000000e+00 : f32
    %20 = vector.broadcast %cst_16 : f32 to vector<128x32xf32>
    %21 = arith.maximumf %19, %20 : vector<128x32xf32>
    %c0_17 = arith.constant 0 : index
    %c0_18 = arith.constant 0 : index
    %22 = vector.load %arg8[%c0_17, %c0_18] : memref<1x32xf32, #tpu.memory_space<vmem>>, vector<1x32xf32>
    %cst_19 = arith.constant dense<0.000000e+00> : vector<1x128xf32>
    %23 = tpu.matmul %22, %21, %cst_19 {dimension_numbers = #tpu.dot_dimension_numbers<[1], [1], [0], [0], [0, 0, 1, 0], [], []>} : vector<1x32xf32>, vector<128x32xf32>, vector<1x128xf32> -> vector<1x128xf32>
    %c0_20 = arith.constant 0 : index
    %c0_21 = arith.constant 0 : index
    %24 = vector.load %arg9[%c0_20, %c0_21] : memref<1x1xf32, #tpu.memory_space<vmem>>, vector<1x1xf32>
    %25 = vector.broadcast %24 : vector<1x1xf32> to vector<1x128xf32>
    %26 = arith.addf %23, %25 : vector<1x128xf32>
    %c0_22 = arith.constant 0 : index
    %c0_23 = arith.constant 0 : index
    %27 = vector.load %arg10[%c0_22, %c0_23] : memref<1x128xf32, #tpu.memory_space<vmem>>, vector<1x128xf32>
    tpu.vector_store %arg10[%c0_22, %c0_23], %26 {strides = array<i32>} : memref<1x128xf32, #tpu.memory_space<vmem>>, vector<1x128xf32>,
    return
  }
  func.func @transform_0(%arg0: i32) -> (i32, i32) {
    %c0_i32 = arith.constant 0 : i32
    %c0_i32_0 = arith.constant 0 : i32
    return %arg0, %c0_i32 : i32, i32
  }
  func.func @transform_1(%arg0: i32) -> (i32, i32) {
    %c0_i32 = arith.constant 0 : i32
    %c0_i32_0 = arith.constant 0 : i32
    return %arg0, %c0_i32 : i32, i32
  }
  func.func @transform_2(%arg0: i32) -> (i32, i32) {
    %c0_i32 = arith.constant 0 : i32
    %c0_i32_0 = arith.constant 0 : i32
    %c0_i32_1 = arith.constant 0 : i32
    return %c0_i32, %c0_i32_0 : i32, i32
  }
  func.func @transform_3(%arg0: i32) -> (i32, i32) {
    %c0_i32 = arith.constant 0 : i32
    %c0_i32_0 = arith.constant 0 : i32
    %c0_i32_1 = arith.constant 0 : i32
    return %c0_i32, %c0_i32_0 : i32, i32
  }
  func.func @transform_4(%arg0: i32) -> (i32, i32) {
    %c0_i32 = arith.constant 0 : i32
    %c0_i32_0 = arith.constant 0 : i32
    %c0_i32_1 = arith.constant 0 : i32
    return %c0_i32, %c0_i32_0 : i32, i32
  }
  func.func @transform_5(%arg0: i32) -> (i32, i32) {
    %c0_i32 = arith.constant 0 : i32
    %c0_i32_0 = arith.constant 0 : i32
    %c0_i32_1 = arith.constant 0 : i32
    return %c0_i32, %c0_i32_0 : i32, i32
  }
  func.func @transform_6(%arg0: i32) -> (i32, i32) {
    %c0_i32 = arith.constant 0 : i32
    %c0_i32_0 = arith.constant 0 : i32
    %c0_i32_1 = arith.constant 0 : i32
    return %c0_i32, %c0_i32_0 : i32, i32
  }
  func.func @transform_7(%arg0: i32) -> (i32, i32) {
    %c0_i32 = arith.constant 0 : i32
    %c0_i32_0 = arith.constant 0 : i32
    %c0_i32_1 = arith.constant 0 : i32
    return %c0_i32, %c0_i32_0 : i32, i32
  }
  func.func @transform_8(%arg0: i32) -> (i32, i32) {
    %c0_i32 = arith.constant 0 : i32
    %c0_i32_0 = arith.constant 0 : i32
    %c0_i32_1 = arith.constant 0 : i32
    return %c0_i32, %c0_i32_0 : i32, i32
  }
  func.func @transform_9(%arg0: i32) -> (i32, i32) {
    %c0_i32 = arith.constant 0 : i32
    %c0_i32_0 = arith.constant 0 : i32
    return %c0_i32, %arg0 : i32, i32
  }
}

</mosaic_0001>

<bundles_post_ra>
// kernel: tpu_custom_call.1
= control target key start
LH: loop header
LB: loop body
LE: loop exit
PB: predicated region body
PF: predicated region fallthrough
CT: control target
= control target key end

     0   :  { %s836_s0 = inlined_call_operand.vmem [shape: f32[128,24], index: 0, kind: input, shape index: {}]   ;;  %s837_s1 = inlined_call_operand.vmem [shape: f32[128,8], index: 1, kind: input, shape index: {}]   ;;  %s838_s2 = inlined_call_operand.vmem [shape: bf16[24,32], index: 2, kind: input, shape index: {}]   ;;  %s839_s3 = inlined_call_operand.vmem [shape: bf16[8,32], index: 3, kind: input, shape index: {}]   ;;  %s840_s4 = inlined_call_operand.vmem [shape: f32[1,32], index: 4, kind: input, shape index: {}]   ;;  %s841_s5 = inlined_call_operand.vmem [shape: bf16[32,32], index: 5, kind: input, shape index: {}]   ;;  %s842_s6 = inlined_call_operand.vmem [shape: f32[1,32], index: 6, kind: input, shape index: {}]   ;;  %s843_s7 = inlined_call_operand.vmem [shape: f32[1,32], index: 7, kind: input, shape index: {}]   ;;  %s844_s8 = inlined_call_operand.<no memory space> [shape: f32[1,1], index: 8, kind: input, shape index: {}]   ;;  %s845_s9 = inlined_call_operand.hbm [shape: f32[1,128], index: 9, kind: output, shape index: {}]  }
   0x1   :  { %v14_v0 = vstv %s844_s8 }
   0x2   :  { %15 = vst [vmem:[#allocation2] sm:$0x1] %v14_v0 }
   0x3   :  { %v87_v1 = vld [vmem:[%s839_s3] sm:$0xf]  ;;  %vm113_vm0 = vcmask 1043456   ;;  %v74_v2 = vld [vmem:[%s837_s1 + $0x70] sm:$0xff]  ;;  %v75_v3 = vld [vmem:[%s837_s1 + $0x78] sm:$0xff]  ;;  %vm88_vm1 = vcmask 64512  }
   0x4   :  { %v115_v4 = vsel %vm113_vm0, %v87_v1, 0  ;;  %v83_v5 = vpack.c.bf16 %v75_v3, %v74_v2  ;;  %v86_v6 = vld [vmem:[%s838_s2 + $0x8] sm:$0xf]  ;;  %v60_v7 = vld [vmem:[%s837_s1] sm:$0xff] }
   0x5   :  { %558 = vmatpush.bf16.msra.mxu1 %v115_v4  ;;  %v171_v8 = vunpack.c.l.b16 %v86_v6  ;;  %124 = vmatpush.bf16.msra.mxu0 %v115_v4  ;;  %v61_v9 = vld [vmem:[%s837_s1 + $0x8] sm:$0xff]  ;;  %v555_v13 = vld [vmem:[%s838_s2] sm:$0xff] }
   0x6   :  { %v76_v10 = vpack.c.bf16 %v61_v9, %v60_v7  ;;  %v44_v14 = vld [vmem:[%s836_s0 + $0x40] sm:$0xff]  ;;  %v45_v15 = vld [vmem:[%s836_s0 + $0x48] sm:$0xff] }
   0x7   :  { %v173_v11 = vpack.c.b16 %v171_v8, %v171_v8 }
   0x8   :  { %509 = vmatmul.msk.bf16.vlgmr.msra.gmra.mxu1 %vm88_vm1, %v83_v5  ;;  %502 = vmatmul.msk.bf16.vlgmr.msra.gmra.mxu0 %vm88_vm1, %v76_v10 }
   0x9   :  { %v201_v12 = vsel %vm113_vm0, %v173_v11, 0 }
   0xa   :  { %209 = vmatpush.bf16.msrb.mxu1 %v201_v12  ;;  %559 = vmatpush.bf16.msra.mxu3 %v201_v12 }
   0xb   :  { %16 = vsyncpa [#allocation4], 0  ;;  %v56_v16 = vpack.c.bf16 %v45_v15, %v44_v14  ;;  %vm175_vm2 = vcmask 195584   ;;  %v36_v17 = vld [vmem:[%s836_s0] sm:$0xff]  ;;  %v37_v18 = vld [vmem:[%s836_s0 + $0x8] sm:$0xff]  ;;  %vm316_vm3 = vcmask 261120  }
   0xc   :  { %v62_v19 = vld [vmem:[%s837_s1 + $0x10] sm:$0xff]  ;;  %v63_v20 = vld [vmem:[%s837_s1 + $0x18] sm:$0xff]  ;;  %v52_v21 = vpack.c.bf16 %v37_v18, %v36_v17  ;;  %v64_v28 = vld [vmem:[%s837_s1 + $0x20] sm:$0xff]  ;;  %s595_s14 = smov [#allocation3]   ;;  %s493_s18 = sshll.u32 %s845_s9, 4  ;;  %s494_s18 = int_to_ptr.hbm [resolvable:$true] %s493_s18 }
   0xd   :  { %v77_v22 = vpack.c.bf16 %v63_v20, %v62_v19  ;;  %v46_v23 = vld [vmem:[%s836_s0 + $0x50] sm:$0xff]  ;;  %v47_v24 = vld [vmem:[%s836_s0 + $0x58] sm:$0xff]  ;;  %v65_v29 = vld [vmem:[%s837_s1 + $0x28] sm:$0xff]  ;;  %s491_s15 = sshll.u32 %s595_s14, 4  ;;  %s492_s15 = int_to_ptr.vmem [resolvable:$true] %s491_s15 }
   0xe   :  { %560 = vmatpush.bf16.msra.mxu3 %v555_v13  ;;  %210 = vmatpush.bf16.msrb.mxu1 %v555_v13  ;;  %v57_v25 = vpack.c.bf16 %v47_v24, %v46_v23  ;;  %v38_v26 = vld [vmem:[%s836_s0 + $0x10] sm:$0xff]  ;;  %v39_v27 = vld [vmem:[%s836_s0 + $0x18] sm:$0xff]  ;;  %v78_v31 = vpack.c.bf16 %v65_v29, %v64_v28  ;;  %v48_v32 = vld [vmem:[%s836_s0 + $0x60] sm:$0xff] }
   0xf   :  { %v53_v30 = vpack.c.bf16 %v39_v27, %v38_v26  ;;  %v49_v33 = vld [vmem:[%s836_s0 + $0x68] sm:$0xff]  ;;  %v40_v35 = vld [vmem:[%s836_s0 + $0x20] sm:$0xff]  ;;  %v66_v37 = vld [vmem:[%s837_s1 + $0x30] sm:$0xff] }
  0x10   :  { %v58_v34 = vpack.c.bf16 %v49_v33, %v48_v32  ;;  %v41_v36 = vld [vmem:[%s836_s0 + $0x28] sm:$0xff]  ;;  %v67_v38 = vld [vmem:[%s837_s1 + $0x38] sm:$0xff]  ;;  %v50_v41 = vld [vmem:[%s836_s0 + $0x70] sm:$0xff] }
  0x11   :  { %518 = vmatmul.msk.bf16.vlgmr.msra.gmra.mxu3 %vm175_vm2, %v56_v16  ;;  %v54_v39 = vpack.c.bf16 %v41_v36, %v40_v35  ;;  %v79_v40 = vpack.c.bf16 %v67_v38, %v66_v37  ;;  %v51_v42 = vld [vmem:[%s836_s0 + $0x78] sm:$0xff]  ;;  %v42_v44 = vld [vmem:[%s836_s0 + $0x30] sm:$0xff]  ;;  %v68_v46 = vld [vmem:[%s837_s1 + $0x40] sm:$0xff] }
  0x12   :  { %v59_v43 = vpack.c.bf16 %v51_v42, %v50_v41  ;;  %v43_v45 = vld [vmem:[%s836_s0 + $0x38] sm:$0xff]  ;;  %v69_v47 = vld [vmem:[%s837_s1 + $0x48] sm:$0xff]  ;;  %v70_v50 = vld [vmem:[%s837_s1 + $0x50] sm:$0xff] }
  0x13   :  { %v55_v48 = vpack.c.bf16 %v43_v45, %v42_v44  ;;  %v80_v49 = vpack.c.bf16 %v69_v47, %v68_v46  ;;  %v71_v51 = vld [vmem:[%s837_s1 + $0x58] sm:$0xff]  ;;  %v72_v53 = vld [vmem:[%s837_s1 + $0x60] sm:$0xff]  ;;  %v73_v54 = vld [vmem:[%s837_s1 + $0x68] sm:$0xff] }
  0x14   :  { %v81_v52 = vpack.c.bf16 %v71_v51, %v70_v50  ;;  %v82_v55 = vpack.c.bf16 %v73_v54, %v72_v53  ;;  %v557_v56 = vld [vmem:[%s841_s5 + $0x8] sm:$0xff]  ;;  %v556_v57 = vld [vmem:[%s841_s5] sm:$0xff] }
  0x15   :  { %347 = vmatpush.bf16.msra.mxu1 %v557_v56  ;;  %561 = vmatpush.bf16.msra.mxu2 %v557_v56  ;;  %v783_v2 = vld [vmem:[%s840_s4] ss:$0 sm:$0xff] }
  0x18   :  { %514 = vmatmul.msk.bf16.vlgmr.msrb.gmra.mxu1 %vm175_vm2, %v52_v21  ;;  %503 = vmatmul.msk.bf16.gmra.mxu0 %vm88_vm1, %v77_v22 }
  0x19   :  { %348 = vmatpush.bf16.msra.mxu1 %v556_v57  ;;  %562 = vmatpush.bf16.msra.mxu2 %v556_v57 }
  0x21   :  { %519 = vmatmul.msk.bf16.gmra.mxu3 %vm175_vm2, %v57_v25 }
  0x28   :  { %515 = vmatmul.msk.bf16.gmra.mxu1 %vm175_vm2, %v53_v30  ;;  %504 = vmatmul.msk.bf16.gmra.mxu0 %vm88_vm1, %v78_v31 }
  0x31   :  { %520 = vmatmul.msk.bf16.gmra.mxu3 %vm175_vm2, %v58_v34 }
  0x38   :  { %516 = vmatmul.msk.bf16.gmra.mxu1 %vm175_vm2, %v54_v39  ;;  %505 = vmatmul.msk.bf16.gmra.mxu0 %vm88_vm1, %v79_v40 }
  0x41   :  { %521 = vmatmul.msk.bf16.gmra.mxu3 %vm175_vm2, %v59_v43 }
  0x48   :  { %517 = vmatmul.msk.bf16.gmra.mxu1 %vm175_vm2, %v55_v48  ;;  %506 = vmatmul.msk.bf16.gmra.mxu0 %vm88_vm1, %v80_v49 }
  0x58   :  { %507 = vmatmul.msk.bf16.gmra.mxu0 %vm88_vm1, %v81_v52 }
  0x68   :  { %508 = vmatmul.msk.bf16.gmra.mxu0 %vm88_vm1, %v82_v55 }
  0x85   :  { %v161_v58 = vpop.f32.mrf.mxu1  ;;  %v126_v59 = vpop.f32.mrf.mxu0 }
  0x8d   :  { %v163_v60 = vpop.f32.mrf.mxu1  ;;  %v128_v61 = vpop.f32.mrf.mxu0 }
  0x94   :  { %v778_v62 = vpop.f32.mrf.mxu3 }
  0x95   :  { %v212_v63 = vpop.f32.mrf.mxu1  ;;  %v131_v0 = vpop.f32.mrf.mxu0 }
  0x96   :  { %v213_v1 = vadd.f32 %v212_v63, %v126_v59 }
  0x98   :  { %v256_v6 = vadd.f32 %v783_v2, %v213_v1 }
  0x9a   :  { %v272_v9 = vmax.f32 %v256_v6, 0.0 }
  0x9c   :  { %v234_v3 = vpop.f32.mrf.mxu3 }
  0x9d   :  { %v214_v4 = vpop.f32.mrf.mxu1  ;;  %v133_v5 = vpop.f32.mrf.mxu0 }
  0x9e   :  { %v215_v7 = vadd.f32 %v214_v4, %v128_v61 }
  0xa0   :  { %v257_v8 = vadd.f32 %v783_v2, %v215_v7 }
  0xa2   :  { %v273_v10 = vmax.f32 %v257_v8, 0.0 }
  0xa4   :  { %v288_v11 = vpack.c.bf16 %v273_v10, %v272_v9  ;;  %v237_v12 = vpop.f32.mrf.mxu3 }
  0xa5   :  { %v217_v13 = vpop.f32.mrf.mxu1  ;;  %v136_v14 = vpop.f32.mrf.mxu0 }
  0xa6   :  { %530 = vmatmul.msk.bf16.vlgmr.msra.gmra.mxu1 %vm316_vm3, %v288_v11  ;;  %v218_v15 = vadd.f32 %v217_v13, %v131_v0 }
  0xa8   :  { %v258_v19 = vadd.f32 %v783_v2, %v218_v15 }
  0xaa   :  { %v274_v22 = vmax.f32 %v258_v19, 0.0 }
  0xac   :  { %v239_v16 = vpop.f32.mrf.mxu3 }
  0xad   :  { %v219_v17 = vpop.f32.mrf.mxu1  ;;  %v138_v18 = vpop.f32.mrf.mxu0 }
  0xae   :  { %v220_v20 = vadd.f32 %v219_v17, %v133_v5 }
  0xb0   :  { %v259_v21 = vadd.f32 %v783_v2, %v220_v20 }
  0xb2   :  { %v275_v23 = vmax.f32 %v259_v21, 0.0 }
  0xb4   :  { %v242_v24 = vpop.f32.mrf.mxu3  ;;  %v289_v25 = vpack.c.bf16 %v275_v23, %v274_v22 }
  0xb5   :  { %v222_v26 = vpop.f32.mrf.mxu1  ;;  %v141_v27 = vpop.f32.mrf.mxu0 }
  0xb6   :  { %531 = vmatmul.msk.bf16.vlgmr.msra.gmra.mxu2 %vm316_vm3, %v289_v25  ;;  %v223_v28 = vadd.f32 %v222_v26, %v136_v14 }
  0xb8   :  { %v260_v32 = vadd.f32 %v783_v2, %v223_v28 }
  0xba   :  { %v276_v35 = vmax.f32 %v260_v32, 0.0  ;;  %v567_v32 = vld [vmem:[%s842_s6] ss:$0 sm:$0xff] }
  0xbc   :  { %v244_v29 = vpop.f32.mrf.mxu3 }
  0xbd   :  { %v224_v30 = vpop.f32.mrf.mxu1  ;;  %v143_v31 = vpop.f32.mrf.mxu0 }
  0xbe   :  { %v225_v33 = vadd.f32 %v224_v30, %v138_v18 }
  0xc0   :  { %v261_v34 = vadd.f32 %v783_v2, %v225_v33 }
  0xc2   :  { %v277_v36 = vmax.f32 %v261_v34, 0.0 }
  0xc4   :  { %v247_v37 = vpop.f32.mrf.mxu3  ;;  %v290_v38 = vpack.c.bf16 %v277_v36, %v276_v35 }
  0xc5   :  { %v227_v39 = vpop.f32.mrf.mxu1  ;;  %v146_v40 = vpop.f32.mrf.mxu0  ;;  %v248_v41 = vadd.f32 %v247_v37, %v161_v58 }
  0xc6   :  { %532 = vmatmul.msk.bf16.gmra.mxu2 %vm316_vm3, %v290_v38  ;;  %v228_v42 = vadd.f32 %v227_v39, %v141_v27  ;;  %v233_v59 = vadd.f32 %v778_v62, %v146_v40 }
  0xc7   :  { %v270_v44 = vadd.f32 %v783_v2, %v248_v41 }
  0xc8   :  { %v262_v48 = vadd.f32 %v783_v2, %v228_v42  ;;  %v264_v61 = vadd.f32 %v783_v2, %v233_v59 }
  0xc9   :  { %v286_v52 = vmax.f32 %v270_v44, 0.0 }
  0xca   :  { %v278_v54 = vmax.f32 %v262_v48, 0.0  ;;  %v280_v0 = vmax.f32 %v264_v61, 0.0 }
  0xcc   :  { %v249_v43 = vpop.f32.mrf.mxu3 }
  0xcd   :  { %v250_v45 = vadd.f32 %v249_v43, %v163_v60  ;;  %v229_v46 = vpop.f32.mrf.mxu1  ;;  %v148_v47 = vpop.f32.mrf.mxu0 }
  0xce   :  { %v230_v49 = vadd.f32 %v229_v46, %v143_v31  ;;  %v235_v60 = vadd.f32 %v234_v3, %v148_v47 }
  0xcf   :  { %v271_v50 = vadd.f32 %v783_v2, %v250_v45 }
  0xd0   :  { %v263_v51 = vadd.f32 %v783_v2, %v230_v49  ;;  %v265_v63 = vadd.f32 %v783_v2, %v235_v60 }
  0xd1   :  { %v287_v53 = vmax.f32 %v271_v50, 0.0 }
  0xd2   :  { %v279_v55 = vmax.f32 %v263_v51, 0.0  ;;  %v281_v1 = vmax.f32 %v265_v63, 0.0 }
  0xd3   :  { %v295_v56 = vpack.c.bf16 %v287_v53, %v286_v52  ;;  %v407_v53 = vld [vmem:[#allocation2] sm:$0x1] }
  0xd4   :  { %v291_v57 = vpack.c.bf16 %v279_v55, %v278_v54  ;;  %v292_v5 = vpack.c.bf16 %v281_v1, %v280_v0  ;;  %v594_v54 = vmov 0  }
  0xd5   :  { %v151_v58 = vpop.f32.mrf.mxu0  ;;  %565 = vset.pattern.permute.xlu0 %v594_v54 }
  0xd6   :  { %533 = vmatmul.msk.bf16.gmra.mxu2 %vm316_vm3, %v291_v57  ;;  %v238_v6 = vadd.f32 %v237_v12, %v151_v58  ;;  %410 = vperm.xlu0 %565, %v407_v53  }
  0xd8   :  { %v266_v9 = vadd.f32 %v783_v2, %v238_v6 }
  0xda   :  { %v282_v11 = vmax.f32 %v266_v9, 0.0  ;;  %v406_v9 = vld [vmem:[%s843_s7] sm:$0x1] }
  0xdd   :  { %v153_v4 = vpop.f32.mrf.mxu0 }
  0xde   :  { %v240_v7 = vadd.f32 %v239_v16, %v153_v4 }
  0xe0   :  { %v267_v10 = vadd.f32 %v783_v2, %v240_v7 }
  0xe2   :  { %v283_v62 = vmax.f32 %v267_v10, 0.0 }
  0xe4   :  { %v293_v3 = vpack.c.bf16 %v283_v62, %v282_v11 }
  0xe5   :  { %v156_v8 = vpop.f32.mrf.mxu0 }
  0xe6   :  { %534 = vmatmul.msk.bf16.gmra.mxu2 %vm316_vm3, %v292_v5  ;;  %v243_v14 = vadd.f32 %v242_v24, %v156_v8 }
  0xe8   :  { %v268_v17 = vadd.f32 %v783_v2, %v243_v14 }
  0xea   :  { %v284_v19 = vmax.f32 %v268_v17, 0.0 }
  0xed   :  { %v158_v13 = vpop.f32.mrf.mxu0 }
  0xee   :  { %v245_v15 = vadd.f32 %v244_v29, %v158_v13 }
  0xf0   :  { %v269_v18 = vadd.f32 %v783_v2, %v245_v15 }
  0xf2   :  { %v285_v12 = vmax.f32 %v269_v18, 0.0 }
  0xf4   :  { %v294_v16 = vpack.c.bf16 %v285_v12, %v284_v19 }
  0xf6   :  { %535 = vmatmul.msk.bf16.gmra.mxu2 %vm316_vm3, %v293_v3 }
 0x106   :  { %536 = vmatmul.msk.bf16.gmra.mxu2 %vm316_vm3, %v294_v16 }
 0x116   :  { %537 = vmatmul.msk.bf16.gmra.mxu2 %vm316_vm3, %v295_v56 }
 0x123   :  { %v350_v57 = vpop.f32.mrf.mxu1 }
 0x124   :  { %v351_v6 = vadd.f32 %v567_v32, %v350_v57 }
 0x126   :  { %v390_v8 = vmax.f32 %v351_v6, 0.0 }
 0x12b   :  { %v352_v1 = vpop.f32.mrf.mxu1 }
 0x12c   :  { %v353_v4 = vadd.f32 %v567_v32, %v352_v1 }
 0x12e   :  { %v391_v7 = vmax.f32 %v353_v4, 0.0 }
 0x139   :  { %v355_v20 = vpop.f32.mrf.mxu2 }
 0x13a   :  { %v356_v63 = vadd.f32 %v567_v32, %v355_v20 }
 0x13c   :  { %v392_v5 = vmax.f32 %v356_v63, 0.0 }
 0x141   :  { %v357_v21 = vpop.f32.mrf.mxu2 }
 0x142   :  { %v358_v60 = vadd.f32 %v567_v32, %v357_v21 }
 0x144   :  { %v393_v0 = vmax.f32 %v358_v60, 0.0 }
 0x148   :  { %v411_v10 = vpop.permute.xlu0 %410 }
 0x149   :  { %v360_v22 = vpop.f32.mrf.mxu2  ;;  %v413_v11 = vperm.slane %v411_v10, 0 }
 0x14a   :  { %v361_v58 = vadd.f32 %v567_v32, %v360_v22 }
 0x14c   :  { %v394_v61 = vmax.f32 %v361_v58, 0.0 }
 0x151   :  { %v362_v23 = vpop.f32.mrf.mxu2 }
 0x152   :  { %v363_v55 = vadd.f32 %v567_v32, %v362_v23 }
 0x154   :  { %v395_v59 = vmax.f32 %v363_v55, 0.0 }
 0x159   :  { %v365_v25 = vpop.f32.mrf.mxu2 }
 0x15a   :  { %v366_v51 = vadd.f32 %v567_v32, %v365_v25 }
 0x15c   :  { %v396_v56 = vmax.f32 %v366_v51, 0.0 }
 0x161   :  { %v367_v26 = vpop.f32.mrf.mxu2 }
 0x162   :  { %v368_v49 = vadd.f32 %v567_v32, %v367_v26 }
 0x164   :  { %v397_v52 = vmax.f32 %v368_v49, 0.0 }
 0x169   :  { %v370_v27 = vpop.f32.mrf.mxu2 }
 0x16a   :  { %v371_v47 = vadd.f32 %v567_v32, %v370_v27 }
 0x16c   :  { %v398_v50 = vmax.f32 %v371_v47, 0.0 }
 0x171   :  { %v372_v24 = vpop.f32.mrf.mxu2 }
 0x172   :  { %v373_v45 = vadd.f32 %v567_v32, %v372_v24 }
 0x174   :  { %v399_v48 = vmax.f32 %v373_v45, 0.0 }
 0x179   :  { %v375_v28 = vpop.f32.mrf.mxu2 }
 0x17a   :  { %v376_v43 = vadd.f32 %v567_v32, %v375_v28 }
 0x17c   :  { %v400_v46 = vmax.f32 %v376_v43, 0.0 }
 0x181   :  { %v377_v29 = vpop.f32.mrf.mxu2 }
 0x182   :  { %v378_v41 = vadd.f32 %v567_v32, %v377_v29 }
 0x184   :  { %v401_v44 = vmax.f32 %v378_v41, 0.0 }
 0x189   :  { %v380_v30 = vpop.f32.mrf.mxu2 }
 0x18a   :  { %v381_v39 = vadd.f32 %v567_v32, %v380_v30 }
 0x18c   :  { %v402_v42 = vmax.f32 %v381_v39, 0.0 }
 0x191   :  { %v382_v31 = vpop.f32.mrf.mxu2 }
 0x192   :  { %v383_v37 = vadd.f32 %v567_v32, %v382_v31 }
 0x194   :  { %v403_v40 = vmax.f32 %v383_v37, 0.0 }
 0x199   :  { %v385_v2 = vpop.f32.mrf.mxu2 }
 0x19a   :  { %v386_v35 = vadd.f32 %v567_v32, %v385_v2 }
 0x19c   :  { %v404_v38 = vmax.f32 %v386_v35, 0.0 }
 0x1a1   :  { %v387_v33 = vpop.f32.mrf.mxu2 }
 0x1a2   :  { %v388_v34 = vadd.f32 %v567_v32, %v387_v33 }
 0x1a4   :  { %v405_v36 = vmax.f32 %v388_v34, 0.0 }
 0x1a6   :  { %538 = vmatpush.xpose.msk.msrb.mxu3 %vm316_vm3, %v405_v36 }
 0x1aa   :  { %539 = vmatpush.xpose.msk.msrb.mxu3 %vm316_vm3, %v404_v38 }
 0x1ae   :  { %540 = vmatpush.xpose.msk.msrb.mxu3 %vm316_vm3, %v403_v40 }
 0x1b2   :  { %541 = vmatpush.xpose.msk.msrb.mxu3 %vm316_vm3, %v402_v42 }
 0x1b6   :  { %542 = vmatpush.xpose.msk.msrb.mxu3 %vm316_vm3, %v401_v44 }
 0x1ba   :  { %543 = vmatpush.xpose.msk.msrb.mxu3 %vm316_vm3, %v400_v46 }
 0x1be   :  { %544 = vmatpush.xpose.msk.msrb.mxu3 %vm316_vm3, %v399_v48 }
 0x1c2   :  { %545 = vmatpush.xpose.msk.msrb.mxu3 %vm316_vm3, %v398_v50 }
 0x1c6   :  { %546 = vmatpush.xpose.msk.msrb.mxu3 %vm316_vm3, %v397_v52 }
 0x1ca   :  { %547 = vmatpush.xpose.msk.msrb.mxu3 %vm316_vm3, %v396_v56 }
 0x1ce   :  { %548 = vmatpush.xpose.msk.msrb.mxu3 %vm316_vm3, %v395_v59 }
 0x1d2   :  { %549 = vmatpush.xpose.msk.msrb.mxu3 %vm316_vm3, %v394_v61 }
 0x1d6   :  { %550 = vmatpush.xpose.msk.msrb.mxu3 %vm316_vm3, %v393_v0 }
 0x1da   :  { %551 = vmatpush.xpose.msk.msrb.mxu3 %vm316_vm3, %v392_v5 }
 0x1de   :  { %552 = vmatpush.xpose.msk.msrb.mxu3 %vm316_vm3, %v391_v7 }
 0x1e2   :  { %553 = vmatpush.xpose.msk.msrb.mxu3 %vm316_vm3, %v390_v8 }
 0x1e5   :  { %554 = vmatmul.msk.f32.vlgmr.msrb.gmra.mxu3 %vm316_vm3, %v406_v9 }
 0x268   :  { %v482_v62 = vpop.f32.mrf.mxu3 }
 0x269   :  { %v483_v3 = vadd.f32 %v482_v62, %v413_v11 }
 0x26b   :  { %485 = vst [vmem:[#allocation3] sm:$0x1] %v483_v3 }
 0x26c   :  { %496 = dma.vmem_to_hbm [thread:$0]  %s492_s15, 16, %s494_s18, [#allocation4]  }
 0x26d   :  { %592 = dma.done.wait [#allocation4], 16  }
 0x26e   :  { %593 = vsyncadd [#allocation4], 4294967280 }
 0x26f   :  { %501 = vsyncpa [#allocation4], 1 }

</bundles_post_ra>
